<compile_context>
chip_gen: v7x
topology: tpu7x:2x2x1
jax: 0.10.0
libtpu: 0.0.40
codegen_flags: <defaults>
</compile_context>

<pallas_src>
import functools

import jax
import jax.numpy as jnp
import numpy as np
from jax.experimental import pallas as pl
from jax.experimental.pallas import tpu as pltpu

_NEG_INF = -1e30  # finite "minus infinity" for padded vocab columns


def _round_up(x, m):
    return ((x + m - 1) // m) * m


def _gather_rows(idx_sm, emb_ref, logits_ref):
    """Gather embedding rows idx_sm[base : base+TM] from the VMEM-resident
    table straight into the logits output block (1 vld + 1 vst per row)."""
    tm = logits_ref.shape[0]
    base = pl.program_id(0) * tm

    def body(r, carry):
        row = idx_sm[base + r]                              # scalar id from SMEM
        logits_ref[pl.ds(r, 1), :] = emb_ref[pl.ds(row, 1), :]
        return carry

    jax.lax.fori_loop(0, tm, body, 0)


def _bigram_train_kernel(idx_sm, tgt_ref, emb_ref, logits_ref, loss_ref, *, vocab):
    _gather_rows(idx_sm, emb_ref, logits_ref)
    logits = logits_ref[...]                                # (TM, V_pad) f32
    tm, v_pad = logits.shape
    col = jax.lax.broadcasted_iota(jnp.int32, (tm, v_pad), 1)
    # Padded vocab columns hold 0 (zero-padded table); mask them to -inf-ish
    # in-kernel so the fused cross entropy ignores them.
    masked = jnp.where(col < vocab, logits, _NEG_INF)
    m = jnp.max(masked, axis=-1, keepdims=True)
    lse = jnp.log(jnp.sum(jnp.exp(masked - m), axis=-1, keepdims=True)) + m
    tgt_logit = jnp.sum(jnp.where(col == tgt_ref[...], logits, 0.0),
                        axis=-1, keepdims=True)
    loss_ref[...] = lse - tgt_logit                         # (TM, 1) per-row loss


def _bigram_infer_kernel(idx_sm, emb_ref, logits_ref):
    # Inference path: gather only -- no cross-entropy work.
    _gather_rows(idx_sm, emb_ref, logits_ref)


def _pad_rows(x, n_pad, fill=0):
    n = x.shape[0]
    if n == n_pad:
        return x
    pad = jnp.full((n_pad - n,) + x.shape[1:], fill, x.dtype)
    return jnp.concatenate([x, pad], axis=0)


def bigram_forward(idx, emb, targets=None, *, block_rows=None):
    """Pallas-backed forward of BigramLanguageModel.

    idx     : (B, T) integer token ids
    emb     : (V, V) float32 embedding table (token_embedding_table.weight)
    targets : optional (B, T) integer targets
    returns (logits, loss):
      - targets is None : logits (B, T, V), loss None
      - else            : logits (B*T, V), loss = scalar mean cross-entropy
    """
    B, T = idx.shape
    V = emb.shape[0]
    N = B * T

    v_pad = _round_up(V, 128)        # lane-dense vocab axis for the output
    v_rows = _round_up(V, 8)         # sublane-aligned row count for the table

    # Row tile: big (up to 256) to amortize per-step overhead, but keep >= 2
    # grid steps when N allows so "parallel" feeds both v7x TensorCores.
    if block_rows is None:
        tm = min(256, _round_up(max(N // 2, 8), 8), _round_up(N, 8))
    else:
        tm = _round_up(max(block_rows, 8), 8)
    n_pad = _round_up(N, tm)
    grid = (n_pad // tm,)

    # Zero-pad the table once (single pass); pad columns are masked in-kernel.
    emb_p = jnp.pad(emb.astype(jnp.float32),
                    ((0, v_rows - V), (0, v_pad - V)))

    idx_flat = _pad_rows(idx.reshape(N).astype(jnp.int32), n_pad)

    compiler_params = pltpu.CompilerParams(
        dimension_semantics=("parallel",),      # independent row blocks
        vmem_limit_bytes=32 * 1024 * 1024,      # fits v5e/v6e/v7x scoped budgets
    )

    # Embedding table: constant index_map -> DMA'd into VMEM once, resident
    # across grid steps.
    emb_spec = pl.BlockSpec((v_rows, v_pad), lambda i, idx_sm: (0, 0))
    logits_spec = pl.BlockSpec((tm, v_pad), lambda i, idx_sm: (i, 0))

    if targets is None:
        logits_p = pl.pallas_call(
            _bigram_infer_kernel,
            grid_spec=pltpu.PrefetchScalarGridSpec(
                num_scalar_prefetch=1,                      # ids -> SMEM
                grid=grid,
                in_specs=[emb_spec],
                out_specs=logits_spec,
            ),
            out_shape=jax.ShapeDtypeStruct((n_pad, v_pad), jnp.float32),
            compiler_params=compiler_params,
        )(idx_flat, emb_p)
        return logits_p[:N, :V].reshape(B, T, V), None

    tgt_flat = _pad_rows(targets.reshape(N).astype(jnp.int32), n_pad).reshape(n_pad, 1)

    kernel = functools.partial(_bigram_train_kernel, vocab=V)
    logits_p, loss_rows = pl.pallas_call(
        kernel,
        grid_spec=pltpu.PrefetchScalarGridSpec(
            num_scalar_prefetch=1,                          # ids -> SMEM
            grid=grid,
            in_specs=[
                pl.BlockSpec((tm, 1), lambda i, idx_sm: (i, 0)),  # targets
                emb_spec,                                          # resident table
            ],
            out_specs=[
                logits_spec,                                       # logits
                pl.BlockSpec((tm, 1), lambda i, idx_sm: (i, 0)),   # per-row loss
            ],
        ),
        out_shape=(
            jax.ShapeDtypeStruct((n_pad, v_pad), jnp.float32),
            jax.ShapeDtypeStruct((n_pad, 1), jnp.float32),
        ),
        compiler_params=compiler_params,
    )(idx_flat, tgt_flat, emb_p)

    logits = logits_p[:N, :V]
    loss = jnp.mean(loss_rows[:N, 0])      # mean over real rows only
    return logits, loss


def _reference(idx, emb, targets):
    """Pure-JAX reference for verification."""
    B, T = idx.shape
    logits = emb[idx]                                  # (B, T, V)
    logits2d = logits.reshape(B * T, -1)
    tgt = targets.reshape(B * T)
    lse = jax.nn.logsumexp(logits2d, axis=-1)
    tgt_logit = jnp.take_along_axis(logits2d, tgt[:, None], axis=-1)[:, 0]
    return logits2d, jnp.mean(lse - tgt_logit)


if __name__ == "__main__":
    key = jax.random.PRNGKey(0)

    # Config 1: toy vocab (V=64), batch=2, seq=8   -> 2-step grid, tiny tiles.
    # Config 2: odd vocab (V=65), batch=4, seq=30  -> 2-step grid + row padding.
    for (V, B, T) in [(64, 2, 8), (65, 4, 30)]:
        key, k_emb, k_idx, k_tgt = jax.random.split(key, 4)
        emb = jax.random.normal(k_emb, (V, V), dtype=jnp.float32)  # nn.Embedding init N(0,1)
        idx = jax.random.randint(k_idx, (B, T), 0, V, dtype=jnp.int32)
        targets = jax.random.randint(k_tgt, (B, T), 0, V, dtype=jnp.int32)

        # Training path: logits (B*T, V), scalar mean cross-entropy loss.
        logits, loss = bigram_forward(idx, emb, targets)
        jax.block_until_ready((logits, loss))

        # Inference path: logits (B, T, V), loss None (gather-only kernel).
        logits_inf, loss_none = bigram_forward(idx, emb, None)
        jax.block_until_ready(logits_inf)
        assert loss_none is None
        assert logits_inf.shape == (B, T, V)

        ref_logits, ref_loss = _reference(idx, emb, targets)
        np.testing.assert_allclose(np.asarray(logits), np.asarray(ref_logits),
                                   rtol=1e-5, atol=1e-5)
        np.testing.assert_allclose(np.asarray(logits_inf.reshape(B * T, V)),
                                   np.asarray(ref_logits), rtol=1e-5, atol=1e-5)
        np.testing.assert_allclose(np.asarray(loss), np.asarray(ref_loss),
                                   rtol=1e-5, atol=1e-5)

    # TODO(synk): generate() (autoregressive torch.multinomial sampling and the
    # optional adaptive-temperature rescale) is a host-side sampling loop and is
    # not kernelized; only forward() is implemented as Pallas kernels.
    print("KERNEL_OK")
</pallas_src>

<mosaic_0001>
module attributes {stable_mosaic.version = 11 : i64} {
  func.func @_bigram_train_kernel(%arg0: i32, %arg1: memref<16xi32, #tpu.memory_space<smem>>, %arg2: memref<8x1xi32, #tpu.memory_space<vmem>>, %arg3: memref<64x128xf32, #tpu.memory_space<vmem>>, %arg4: memref<8x128xf32, #tpu.memory_space<vmem>>, %arg5: memref<8x1xf32, #tpu.memory_space<vmem>>) attributes {dimension_semantics = [#tpu.dimension_semantics<parallel>], iteration_bounds = array<i64: 2>, scalar_prefetch = 1 : i64, scratch_operands = 0 : i64, tpu.core_type = #tpu.core_type<tc>, window_params = [{transform_indices = @transform_0, window_bounds = array<i64: 8, 1>}, {pipeline_mode = #tpu.pipeline_mode<synchronous>, transform_indices = @transform_1, window_bounds = array<i64: 64, 128>}, {transform_indices = @transform_2, window_bounds = array<i64: 8, 128>}, {transform_indices = @transform_3, window_bounds = array<i64: 8, 1>}]} {
    %c8_i32 = arith.constant 8 : i32
    %0 = arith.muli %arg0, %c8_i32 : i32
    %c0_i32 = arith.constant 0 : i32
    %c8_i32_0 = arith.constant 8 : i32
    %1 = arith.addi %c0_i32, %c8_i32_0 : i32
    %c1_i32 = arith.constant 1 : i32
    scf.for %arg6 = %c0_i32 to %1 step %c1_i32  : i32 {
      %26 = arith.addi %0, %arg6 : i32
      %27 = arith.index_cast %26 : i32 to index
      %28 = memref.load %arg1[%27] : memref<16xi32, #tpu.memory_space<smem>>
      %29 = arith.index_cast %28 : i32 to index
      %c0_11 = arith.constant 0 : index
      %30 = vector.load %arg3[%29, %c0_11] : memref<64x128xf32, #tpu.memory_space<vmem>>, vector<1x128xf32>
      %31 = arith.index_cast %arg6 : i32 to index
      %c0_12 = arith.constant 0 : index
      %32 = vector.load %arg4[%31, %c0_12] : memref<8x128xf32, #tpu.memory_space<vmem>>, vector<1x128xf32>
      tpu.vector_store %arg4[%31, %c0_12], %30 {strides = array<i32>} : memref<8x128xf32, #tpu.memory_space<vmem>>, vector<1x128xf32>,
    }
    %c8_i32_1 = arith.constant 8 : i32
    %c0 = arith.constant 0 : index
    %c0_2 = arith.constant 0 : index
    %2 = vector.load %arg4[%c0, %c0_2] : memref<8x128xf32, #tpu.memory_space<vmem>>, vector<8x128xf32>
    %3 = tpu.iota {dimensions = array<i32: 1>} : vector<8x128xi32>
    %c64_i32 = arith.constant 64 : i32
    %4 = vector.broadcast %c64_i32 : i32 to vector<8x128xi32>
    %5 = arith.cmpi slt, %3, %4 : vector<8x128xi32>
    %cst = arith.constant -1.000000e+30 : f32
    %6 = vector.broadcast %cst : f32 to vector<8x128xf32>
    %7 = arith.select %5, %2, %6 : vector<8x128xi1>, vector<8x128xf32>
    %cst_3 = arith.constant dense<0xFF800000> : vector<8xf32>
    %8 = vector.multi_reduction <maximumf>, %7, %cst_3 [1] : vector<8x128xf32> to vector<8xf32>
    %9 = vector.shape_cast %8 : vector<8xf32> to vector<8x1xf32>
    %10 = vector.broadcast %9 : vector<8x1xf32> to vector<8x128xf32>
    %11 = arith.subf %7, %10 : vector<8x128xf32>
    %12 = math.exp %11 : vector<8x128xf32>
    %cst_4 = arith.constant dense<0.000000e+00> : vector<8xf32>
    %13 = vector.multi_reduction <add>, %12, %cst_4 [1] : vector<8x128xf32> to vector<8xf32>
    %14 = vector.shape_cast %13 : vector<8xf32> to vector<8x1xf32>
    %15 = math.log %14 : vector<8x1xf32>
    %16 = arith.addf %15, %9 : vector<8x1xf32>
    %c0_5 = arith.constant 0 : index
    %c0_6 = arith.constant 0 : index
    %17 = vector.load %arg2[%c0_5, %c0_6] : memref<8x1xi32, #tpu.memory_space<vmem>>, vector<8x1xi32>
    %18 = vector.broadcast %17 : vector<8x1xi32> to vector<8x128xi32>
    %19 = arith.cmpi eq, %3, %18 : vector<8x128xi32>
    %cst_7 = arith.constant 0.000000e+00 : f32
    %20 = vector.broadcast %cst_7 : f32 to vector<8x128xf32>
    %21 = arith.select %19, %2, %20 : vector<8x128xi1>, vector<8x128xf32>
    %cst_8 = arith.constant dense<0.000000e+00> : vector<8xf32>
    %22 = vector.multi_reduction <add>, %21, %cst_8 [1] : vector<8x128xf32> to vector<8xf32>
    %23 = vector.shape_cast %22 : vector<8xf32> to vector<8x1xf32>
    %24 = arith.subf %16, %23 : vector<8x1xf32>
    %c0_9 = arith.constant 0 : index
    %c0_10 = arith.constant 0 : index
    %25 = vector.load %arg5[%c0_9, %c0_10] : memref<8x1xf32, #tpu.memory_space<vmem>>, vector<8x1xf32>
    tpu.vector_store %arg5[%c0_9, %c0_10], %24 {strides = array<i32>} : memref<8x1xf32, #tpu.memory_space<vmem>>, vector<8x1xf32>,
    return
  }
  func.func @transform_0(%arg0: i32, %arg1: memref<16xi32, #tpu.memory_space<smem>>) -> (i32, i32) {
    %c0_i32 = arith.constant 0 : i32
    %c0_i32_0 = arith.constant 0 : i32
    return %arg0, %c0_i32 : i32, i32
  }
  func.func @transform_1(%arg0: i32, %arg1: memref<16xi32, #tpu.memory_space<smem>>) -> (i32, i32) {
    %c0_i32 = arith.constant 0 : i32
    %c0_i32_0 = arith.constant 0 : i32
    %c0_i32_1 = arith.constant 0 : i32
    return %c0_i32, %c0_i32_0 : i32, i32
  }
  func.func @transform_2(%arg0: i32, %arg1: memref<16xi32, #tpu.memory_space<smem>>) -> (i32, i32) {
    %c0_i32 = arith.constant 0 : i32
    %c0_i32_0 = arith.constant 0 : i32
    return %arg0, %c0_i32 : i32, i32
  }
  func.func @transform_3(%arg0: i32, %arg1: memref<16xi32, #tpu.memory_space<smem>>) -> (i32, i32) {
    %c0_i32 = arith.constant 0 : i32
    %c0_i32_0 = arith.constant 0 : i32
    return %arg0, %c0_i32 : i32, i32
  }
}

</mosaic_0001>

<bundles_post_ra>
// kernel: tpu_custom_call.1
= control target key start
LH: loop header
LB: loop body
LE: loop exit
PB: predicated region body
PF: predicated region fallthrough
CT: control target
= control target key end

     0   :  { %s739_s0 = inlined_call_operand.vmem [shape: s32[16], index: 0, kind: input, shape index: {}]   ;;  %s740_s1 = inlined_call_operand.vmem [shape: s32[16,1], index: 1, kind: input, shape index: {}]   ;;  %s741_s2 = inlined_call_operand.hbm [shape: f32[64,128], index: 2, kind: input, shape index: {}]   ;;  %s742_s3 = inlined_call_operand.hbm [shape: f32[16,128], index: 3, kind: output, shape index: {0}]   ;;  %s743_s4 = inlined_call_operand.vmem [shape: f32[16,1], index: 4, kind: output, shape index: {1}]  }
   0x1   :  { %s10_s17 = sshll.u32 %s739_s0, 4  ;;  %s11_s17 = int_to_ptr.vmem [resolvable:$true] %s10_s17 }
   0x2   :  { %s442_s18 = scalar_lea.vmem %s11_s17, 16  ;;  %p447_p1 = scmp.lt.s32.totalorder %s11_s17, %s11_s17 }
   0x3   :  { %p443_p0 = scmp.ne.s32.totalorder %s11_s17, %s442_s18  ;;  %p448_p2 = scmp.lt.s32.totalorder %s442_s18, %s442_s18 }
   0x5   :  { %p449_p3 = por %p448_p2, %p447_p1 }
   0x7   :  { %p450_p4 = pnand %p449_p3, %p443_p0 }
   0x9   :  { %453 = shalt.err (!%p450_p4)  }
   0xa   :  { %s560_s19 = smov [#allocation3]  }
   0xb   :  { %13 = dma.vmem_to_smem %s11_s17, 16, %s560_s19, [#allocation2] }
   0xc   :  { %530 = dma.done.wait [#allocation2], 16 }
   0xd   :  { %531 = vsyncadd [#allocation2], 4294967280 }
   0xe   :  { %15 = sfence }
   0xf   :  { %16 = vsyncpa [#allocation5], 0 }
  0x10   :  { %17 = vsyncpa [#allocation6], 0 }
  0x11   :  { %19 = vsyncpa [#allocation6 + $0x1], 0  ;;  %s594_s20 = smov 0   ;;  %s596_s21 = smov 0  }
  0x12   :  { %s598_s0 = smov 0   ;;  %s600_s22 = smov 0  }
  0x13 LB: > { %s615_s23 = sadd.s32 4294967295, %s554_s22   ;;  %s361_s24 = sadd.s32 4294967294, %s554_s22   ;;  %s554_s22 = sphi %s600_s22, %s759_s22   ;;  %s550_s0 = sphi %s598_s0, %s758_s0   ;;  %s546_s21 = sphi %s596_s21, %s757_s21   ;;  %s542_s20 = sphi %s594_s20, %s756_s20  }
  0x14   : > { %s619_s25 = sadd.s32 1, %s554_s22   ;;  %s79_s26 = sadd.s32 1, %s550_s0 }
  0x15   : > { %s76_s27 = ssub.s32 %s554_s22, %s619_s25  ;;  %p89_p5 = scmp.ne.s32.totalorder %s550_s0, %s546_s21 }
  0x16   : > { %p77_p6 = scmp.eq.s32.totalorder %s76_s27, 0  ;;  %p90_p7 = scmp.eq.s32.totalorder %s615_s23, 1 }
  0x17   : > { %p95_p8 = scmp.ne.s32.totalorder %s546_s21, %s542_s20  ;;  %p96_p9 = scmp.eq.s32.totalorder %s361_s24, 1 }
  0x18   : > { %s630_s28 = scalar_select %p77_p6, %s550_s0, %s79_s26  }
  0x19   : > { %p632_p10 = por %p90_p7, %p89_p5  ;;  %p636_p11 = por %p96_p9, %p95_p8 }
  0x1a   : > { %p362_p12 = scmp.ge.s32.totalorder %s554_s22, 1  ;;  %p129_p13 = scmp.lt.s32.totalorder %s554_s22, 3 }
  0x1b   : > { %s747_s29 = scalar_select %p632_p10, 1, 0 }
  0x1c   : > { %s748_s30 = scalar_select %p636_p11, 1, 0 }
  0x1d   : > { %p744_p0 = scmp.eq.s32.totalorder %s615_s23, 0  ;;  %p643_p1 = pnand %p362_p12, %p129_p13 }
  0x1e   : > { %s561_s6 = smov [#allocation4]   ;;  %s454_s11 = scalar_lea.hbm %s741_s2, 1024 }
  0x1f   : > { %s749_s5 = scalar_select %p643_p1, 1, 0 }
  0x20   : > { %s141_s7 = sshll.u32 %s561_s6, 4  ;;  %p381_p2 = pneg %p643_p1  ;;  %s142_s7 = int_to_ptr.vmem [resolvable:$true] %s141_s7 }
  0x21   : > { %p455_p4 = scmp.ne.s32.totalorder %s741_s2, %s454_s11  ;;  %p461_p8 = scmp.lt.u32.totalorder %s454_s11, %s741_s2 }
  0x22   : > { %p651_p3 = pnand %p744_p0, %p381_p2 }
  0x24   : > { %p456_p5 = pneg %p651_p3 }
  0x26   : > { %p457_p6 = pnand %p456_p5, %p455_p4 }
  0x28   : > { %p458_p7 = pneg %p457_p6 }
  0x2a   : > { %p463_p9 = pnand %p461_p8, %p458_p7 }
  0x2c   : > { %466 = shalt.err (!%p463_p9)
}
  0x2d   : > { %s467_s16 = scalar_lea.vmem %s142_s7, 1024  ;;  %p475_p0 = scmp.lt.s32.totalorder %s142_s7, %s142_s7 }
  0x2e   : > { %p468_p12 = scmp.ne.s32.totalorder %s142_s7, %s467_s16  ;;  %p476_p11 = scmp.lt.s32.totalorder %s467_s16, %s467_s16 }
  0x30   : > { %p470_p13 = pnand %p468_p12, %p456_p5  ;;  %p477_p10 = por %p476_p11, %p475_p0 }
  0x32   : > { %p471_p2 = pneg %p470_p13 }
  0x34   : > { %p478_p1 = pnand %p477_p10, %p471_p2 }
  0x36   : > { %481 = shalt.err (!%p478_p1)
}
  0x37   : > { %s562_s17 = smov 128   ;;  %s563_s18 = smov 8  }
  0x38   : > { %384 = dma.hbm_to_vmem [thread:$0]  (!%p651_p3), %s741_s2, 1024, %s142_s7, [#allocation5], %s562_s17, %s562_s17, %s563_s18  }
  0x39   : > { %p751_p4 = scmp.ne.s32.totalorder %s749_s5, 0 }
  0x3a   : > { %p752_p6 = scmp.eq.s32.totalorder (!%p751_p4), %s615_s23, 0 }
  0x3b   : > { %164 = sbr.rel (%p751_p4) target bundleno = 408 (0x198), region = 28 }
  0x42   : > { %533 = dma.done.wait (%p752_p6), [#allocation5], 1024   ;;  %p753_p5 = pmov %p752_p6 }
  0x43   : > { %s182_s26 = sand.u32 1, %s546_s21   ;;  %p191_p10 = scmp.lt.s32.totalorder %s615_s23, 1 }
  0x44   : > { %535 = vsyncadd (%p753_p5), [#allocation5], 4294966272  ;;  %s367_s27 = sshll.u32 %s182_s26, 3  ;;  %s370_s6 = sshll.u32 %s615_s23, 3 }
  0x45   : > { %s192_s7 = scalar_select %p191_p10, %s615_s23, 1 }
  0x46   : > { %s691_s14 = scalar_lea.vmem [#allocation7], %s367_s27  ;;  %s556_s15 = smov 0  }
  0x47   : > { %s368_s8 = sshll.u32 %s192_s7, 3 }
  0x48   : > { %s194_s10 = scalar_lea.vmem %s740_s1, %s368_s8  ;;  %s689_s13 = scalar_lea.vmem %s743_s4, %s368_s8 }
  0x49 LB: >> { %s206_s16 = sadd.s32 %s558_s15, %s370_s6  ;;  %s210_s18 = scalar_lea.vmem %s691_s14, %s558_s15 [#allocation7]  ;;  %s558_s15 = sphi %s556_s15, %s205_s15  }
  0x4a   : >> { %s207_s17 = sld [smem:[#allocation3 + %s206_s16]]  ;;  %s205_s15 = sadd.s32 1, %s558_s15  }
  0x4b   : >> { %p202_p11 = scmp.ge.s32.totalorder %s205_s15, 8  }
  0x4c   : > { %v213_v1 = vlaneseq (%p202_p11)  ;;  %v564_v2 = vmov (%p202_p11), 0   ;;  %v227_v6 = vld [vmem:[%s194_s10] sm:$0xff] (%p202_p11)  ;;  %s372_s24 = sshll.u32 (%p202_p11), %s615_s23, 7  ;;  %s256_s27 = sshll.u32 (%p202_p11), %s691_s14, 4  ;;  %s257_s27 = int_to_ptr.vmem [resolvable:$true] %s256_s27 }
  0x4d   : > { %204 = sbr.rel (!%p202_p11) target bundleno = 73 (0x49), region = 89  ;;  %437 = vset.pattern.permute.xlu0 (%p202_p11), %v564_v2  ;;  %s700_s8 = scalar_lea.hbm (%p202_p11), %s742_s3, %s372_s24 }
  0x4e   : > { %v214_v4 = vand.u32 (%p202_p11), 127, %v213_v1  ;;  %s239_s5 = scalar_lea.sflag (%p202_p11), [#allocation6], %s182_s26  ;;  %s482_s9 = scalar_lea.vmem (%p202_p11), %s257_s27, 128 }
  0x4f   : > { %p483_p0 = scmp.ne.s32.totalorder (%p202_p11), %s257_s27, %s482_s9  ;;  %p754_p1 = scmp.ne.s32.totalorder (%p202_p11), %s747_s29, 0 }
  0x50   : >> { %s208_s19 = scalar_lea.vmem [#allocation4], %s207_s17  ;;  %vm215_vm0 = vcmp.lt.s32.totalorder (%p202_p11), %v214_v4, 64  ;;  %s565_s10 = smov (%p202_p11), [#allocation7]  }
  0x51   : >> { %v209_v0 = vld [vmem:[%s208_s19] sm:$0x1]  ;;  %p484_p3 = pnand (%p202_p11), %p483_p0, %p754_p1  ;;  %s486_s11 = sshll.u32 (%p202_p11), %s565_s10, 4  ;;  %s487_s11 = int_to_ptr.vmem [resolvable:$false] %s486_s11 }
  0x52   : >> { %211 = vst [vmem:[%s210_s18] sm:$0x1] %v209_v0  ;;  %s488_s12 = scalar_lea.vmem (%p202_p11), %s487_s11, 256  ;;  %p489_p8 = scmp.lt.s32.totalorder (%p202_p11), %s257_s27, %s487_s11 }
  0x53   : > { %p485_p7 = pneg (%p202_p11), %p484_p3  ;;  %p490_p9 = scmp.lt.s32.totalorder (%p202_p11), %s488_s12, %s482_s9 }
  0x55   : > { %p491_p12 = por %p490_p9, %p489_p8 }
  0x57   : > { %p492_p13 = pnand %p491_p12, %p485_p7 }
  0x59   : > { %v212_v3 = vld [vmem:[%s691_s14] sm:$0xff] }
  0x5a   : > { %v216_v5 = vsel %vm215_vm0, %v212_v3, -1e+30 }
  0x5b   : > { %217 = vmax.xlane.f32.xlu0 %v216_v5 }
  0x71   : > { %229 = vperm.xlu0 %437, %v227_v6  }
  0xe8   : > { %v218_v7 = vpop.xlane.xlu0 %217 }
  0xe9   : > { %v219_v8 = vsub.f32 %v216_v5, %v218_v7 }
  0xeb   : > { %v220_v9 = vmul.f32 1.442695, %v219_v8 }
  0xed   : > { %438 = vpow2.f32 %v220_v9 }
  0xf0   : > { %v230_v10 = vpop.permute.xlu0 %229 }
  0xf1   : > { %vm231_vm1 = vcmp.eq.s32.totalorder %v214_v4, %v230_v10 }
  0xf2   : > { %v232_v12 = vsel %vm231_vm1, %v212_v3, 0.0 }
  0xf7   : > { %v439_v11 = vpop.eup %438 }
  0xf8   : > { %222 = vadd.xlane.f32.xlu1 %v439_v11 }
  0xfc   : > { %233 = vadd.xlane.f32.xlu1 %v232_v12 }
  0xfd   : > { %495 = shalt.err (!%p492_p13)
}
  0xfe   : > { %s496_s23 = scalar_lea.hbm %s700_s8, 128  ;;  %s500_s15 = scalar_lea.hbm %s742_s3, 256 }
  0xff   : > { %p497_p2 = scmp.ne.s32.totalorder %s700_s8, %s496_s23  ;;  %p501_p5 = scmp.lt.u32.totalorder %s700_s8, %s742_s3 }
 0x100   : > { %p502_p10 = scmp.lt.u32.totalorder %s500_s15, %s496_s23  ;;  %p504_p0 = scmp.lt.u32.totalorder %s496_s23, %s700_s8 }
 0x101   : > { %p498_p4 = pnand %p497_p2, %p754_p1 }
 0x102   : > { %p503_p11 = por %p502_p10, %p501_p5 }
 0x103   : > { %p499_p6 = pneg %p498_p4 }
 0x104   : > { %p505_p3 = por %p504_p0, %p503_p11 }
 0x106   : > { %p506_p7 = pnand %p505_p3, %p499_p6 }
 0x108   : > { %509 = shalt.err (!%p506_p7)
}
 0x109   : > { %379 = dma.vmem_to_hbm [thread:$0]  (%p754_p1), %s257_s27, 128, %s700_s8, %s239_s5   ;;  %vm236_vm2 = vcmask 7168  }
 0x185   : > { %v223_v13 = vpop.xlane.xlu1 %222 }
 0x186   : > { %440 = vlog2.f32 %v223_v13 }
 0x189   : > { %v234_v16 = vpop.xlane.xlu1 %233 }
 0x190   : > { %v441_v14 = vpop.eup %440 }
 0x191   : > { %v225_v15 = vmul.f32 0.6931472, %v441_v14 }
 0x193   : > { %v226_v17 = vadd.f32 %v225_v15, %v218_v7 }
 0x195   : > { %v235_v18 = vsub.f32 %v226_v17, %v234_v16 }
 0x197   : > { %237 = vst.msk [vmem:[%s689_s13] sm:$0xff] %vm236_vm2, %v235_v18 }
 0x198 PF: > { %p391_p8 = scmp.ge.s32.totalorder %s554_s22, 2  ;;  %s271_s18 = sand.u32 1, %s542_s20  }
 0x199   : > { %p755_p9 = scmp.ne.s32.totalorder %s748_s30, 0  ;;  %s272_s29 = scalar_lea.sflag [#allocation6], %s271_s18 }
 0x19b   : > { %p386_p12 = pnand %p391_p8, %p755_p9 }
 0x19d   : > { %537 = dma.done.wait (!%p386_p12), %s272_s29, 128  }
 0x19e   : > { %539 = vsyncadd (!%p386_p12), %s272_s29, 4294967168  ;;  %p22_p1 = scmp.ge.s32.totalorder %s619_s25, 4   ;;  %s756_s20 = smov %s546_s21 }
 0x19f   : > { %s757_s21 = smov %s550_s0  ;;  %s758_s0 = smov %s630_s28 }
 0x1a0   : > { %s759_s22 = smov %s619_s25  ;;  %24 = sbr.rel (!%p22_p1) target bundleno = 19 (0x13), region = 100 }
 0x1a7   :  { %284 = vsyncpa [#allocation5], 1 }
 0x1a8   :  { %286 = vsyncpa [#allocation5 + $0x1], 1 }
 0x1a9   :  { %287 = vsyncpa [#allocation6], 1 }
 0x1aa   :  { %289 = vsyncpa [#allocation6 + $0x1], 1 }

</bundles_post_ra>
